<compile_context>
chip_gen: v5e
topology: v5e:2x2
jax: 0.10.0
libtpu: 0.0.40
codegen_flags: <defaults>
</compile_context>

<pallas_src>
import math
import numpy as np
import jax
import jax.numpy as jnp
from jax.experimental import pallas as pl
from jax.experimental.pallas import tpu as pltpu


def _gaussian_1d(kernel_size):
    """Normalized 1D Gaussian identical (separably) to Smoothing.__init__."""
    k = kernel_size + 1 - kernel_size % 2          # force odd
    sigma = k / 4.0
    coords = np.arange(k, dtype=np.float64)
    mean = (k - 1) / 2.0
    g = (1.0 / (sigma * math.sqrt(2.0 * math.pi))) * np.exp(
        -(((coords - mean) / sigma) ** 2) / 2.0
    )
    g = g / g.sum()   # outer(g,g,g) is then exactly the normalized 3D kernel
    return g, k


def make_smoothing(grid_size, kernel_size, clip):
    D, H, W = grid_size
    HW = H * W
    g1d, k = _gaussian_1d(kernel_size)
    pad = k // 2
    assert pad < D and pad < H and pad < W, "kernel radius must fit inside the grid"

    # 3D tap weights (separable Gaussian), baked in as python float constants.
    w3 = np.einsum("j,i,m->jim", g1d, g1d, g1d)          # (k, k, k), sums to 1
    taps = [[[float(w3[j, i, m]) for m in range(k)]
             for i in range(k)] for j in range(k)]

    # Padded input layout: pad D by `pad` sublanes; pad the flattened H*W
    # lane axis by pad*W + pad per side.  Padding H by `pad` rows is exactly
    # a lane pad of pad*W per side in the row-major flattening; the extra
    # `pad` lanes keep every shifted W-tap load in bounds.
    Dp = D + 2 * pad
    lane_pad = pad * W + pad
    Lp = HW + 2 * lane_pad

    # 0/1 masks zeroing the W taps that would otherwise read across an H row
    # boundary (w + m - pad outside [0, W)); depends only on w = l % W.
    w_of_l = np.tile(np.arange(W), H)                    # (HW,)
    masks_np = np.ones((k, D, HW), dtype=np.float32)
    for m in range(k):
        src = w_of_l + (m - pad)
        valid = ((src >= 0) & (src < W)).astype(np.float32)
        masks_np[m] = np.broadcast_to(valid, (D, HW))
    masks = jnp.asarray(masks_np)

    def smoothing_kernel(x_ref, mask_ref, out_ref):
        # x_ref: (Dp, Lp) zero-padded volume; mask_ref: (k, D, HW) f32;
        # out_ref: (D, HW) lane-dense (unmasked vst).
        acc = None
        for m in range(k):                               # W tap
            part = None
            for i in range(k):                           # H tap
                lane_off = i * W + m
                for j in range(k):                       # D tap
                    tap = taps[j][i][m] * x_ref[j:j + D, lane_off:lane_off + HW]
                    part = tap if part is None else part + tap
            if m != pad:                                 # center W tap never wraps
                part = part * mask_ref[m]
            acc = part if acc is None else acc + part
        if clip:   # static python scalar; clip == 0 / 0.0 disables (matches PyTorch)
            x_orig = x_ref[pad:pad + D, lane_pad:lane_pad + HW]
            acc = jnp.maximum(jnp.minimum(x_orig, acc + clip), acc - clip)
        out_ref[...] = acc

    conv_call = pl.pallas_call(
        smoothing_kernel,
        out_shape=jax.ShapeDtypeStruct((D, HW), jnp.float32),
        in_specs=[pl.BlockSpec(memory_space=pltpu.MemorySpace.VMEM),
                  pl.BlockSpec(memory_space=pltpu.MemorySpace.VMEM)],
        out_specs=pl.BlockSpec(memory_space=pltpu.MemorySpace.VMEM),
    )

    # TODO(synk): if volumes ever come batched, add a leading batch grid axis
    # with dimension_semantics=("parallel",) so v7x shards across both
    # TensorCores; for production-scale grids, tile D/H with a `pad` halo
    # instead of one whole-volume VMEM block.

    @jax.jit
    def forward(flat_input):
        x2 = flat_input.reshape(D, HW).astype(jnp.float32)
        xp = jnp.pad(x2, ((pad, pad), (lane_pad, lane_pad)))   # one fused XLA pad
        return conv_call(xp, masks).reshape(-1)

    return forward


def _reference_forward(flat_input, grid_size, kernel_size, clip):
    """Pure-numpy reference of Smoothing.forward (zero-padded conv3d + clip)."""
    g1d, k = _gaussian_1d(kernel_size)
    kern_np = (g1d[:, None, None] * g1d[None, :, None] * g1d[None, None, :]).astype(
        np.float32
    )
    pad = k // 2
    D, H, W = grid_size
    x = np.asarray(flat_input, dtype=np.float32).reshape(D, H, W)
    p = np.pad(x, pad)
    out = np.zeros_like(x)
    for kd in range(k):
        for kh in range(k):
            for kw in range(k):
                out += kern_np[kd, kh, kw] * p[kd:kd + D, kh:kh + H, kw:kw + W]
    if clip:
        out = np.maximum(np.minimum(x, out + clip), out - clip)
    return out.reshape(-1)


if __name__ == "__main__":
    grid_size = (8, 16, 16)   # (D, H, W) -> working layout (8, 256), lane-dense
    kernel_size = 3
    clip = 0.05

    fwd = make_smoothing(grid_size, kernel_size, clip)

    key = jax.random.PRNGKey(0)
    n = int(np.prod(grid_size))
    flat_input = jax.random.normal(key, (n,), dtype=jnp.float32)

    out = fwd(flat_input)
    jax.block_until_ready(out)

    ref = _reference_forward(np.asarray(flat_input), grid_size, kernel_size, clip)
    np.testing.assert_allclose(np.asarray(out), ref, rtol=1e-5, atol=1e-5)

    print("KERNEL_OK")
</pallas_src>

<mosaic_0001>
module attributes {stable_mosaic.version = 11 : i64} {
  func.func @smoothing_kernel(%arg0: memref<10x290xf32, #tpu.memory_space<vmem>>, %arg1: memref<3x8x256xf32, #tpu.memory_space<vmem>>, %arg2: memref<8x256xf32, #tpu.memory_space<vmem>>) attributes {dimension_semantics = [], scalar_prefetch = 0 : i64, scratch_operands = 0 : i64, tpu.core_type = #tpu.core_type<tc>} {
    %c0 = arith.constant 0 : index
    %c0_0 = arith.constant 0 : index
    %0 = vector.load %arg0[%c0, %c0_0] : memref<10x290xf32, #tpu.memory_space<vmem>>, vector<8x256xf32>
    %cst = arith.constant 0.011483537 : f32
    %1 = vector.broadcast %cst : f32 to vector<8x256xf32>
    %2 = arith.mulf %1, %0 : vector<8x256xf32>
    %c1 = arith.constant 1 : index
    %c0_1 = arith.constant 0 : index
    %3 = vector.load %arg0[%c1, %c0_1] : memref<10x290xf32, #tpu.memory_space<vmem>>, vector<8x256xf32>
    %cst_2 = arith.constant 0.0279328488 : f32
    %4 = vector.broadcast %cst_2 : f32 to vector<8x256xf32>
    %5 = arith.mulf %4, %3 : vector<8x256xf32>
    %6 = arith.addf %2, %5 : vector<8x256xf32>
    %c2 = arith.constant 2 : index
    %c0_3 = arith.constant 0 : index
    %7 = vector.load %arg0[%c2, %c0_3] : memref<10x290xf32, #tpu.memory_space<vmem>>, vector<8x256xf32>
    %cst_4 = arith.constant 0.011483537 : f32
    %8 = vector.broadcast %cst_4 : f32 to vector<8x256xf32>
    %9 = arith.mulf %8, %7 : vector<8x256xf32>
    %10 = arith.addf %6, %9 : vector<8x256xf32>
    %c0_5 = arith.constant 0 : index
    %c16 = arith.constant 16 : index
    %11 = vector.load %arg0[%c0_5, %c16] : memref<10x290xf32, #tpu.memory_space<vmem>>, vector<8x256xf32>
    %cst_6 = arith.constant 0.0279328488 : f32
    %12 = vector.broadcast %cst_6 : f32 to vector<8x256xf32>
    %13 = arith.mulf %12, %11 : vector<8x256xf32>
    %14 = arith.addf %10, %13 : vector<8x256xf32>
    %c1_7 = arith.constant 1 : index
    %c16_8 = arith.constant 16 : index
    %15 = vector.load %arg0[%c1_7, %c16_8] : memref<10x290xf32, #tpu.memory_space<vmem>>, vector<8x256xf32>
    %cst_9 = arith.constant 0.0679445714 : f32
    %16 = vector.broadcast %cst_9 : f32 to vector<8x256xf32>
    %17 = arith.mulf %16, %15 : vector<8x256xf32>
    %18 = arith.addf %14, %17 : vector<8x256xf32>
    %c2_10 = arith.constant 2 : index
    %c16_11 = arith.constant 16 : index
    %19 = vector.load %arg0[%c2_10, %c16_11] : memref<10x290xf32, #tpu.memory_space<vmem>>, vector<8x256xf32>
    %cst_12 = arith.constant 0.0279328488 : f32
    %20 = vector.broadcast %cst_12 : f32 to vector<8x256xf32>
    %21 = arith.mulf %20, %19 : vector<8x256xf32>
    %22 = arith.addf %18, %21 : vector<8x256xf32>
    %c0_13 = arith.constant 0 : index
    %c32 = arith.constant 32 : index
    %23 = vector.load %arg0[%c0_13, %c32] : memref<10x290xf32, #tpu.memory_space<vmem>>, vector<8x256xf32>
    %cst_14 = arith.constant 0.011483537 : f32
    %24 = vector.broadcast %cst_14 : f32 to vector<8x256xf32>
    %25 = arith.mulf %24, %23 : vector<8x256xf32>
    %26 = arith.addf %22, %25 : vector<8x256xf32>
    %c1_15 = arith.constant 1 : index
    %c32_16 = arith.constant 32 : index
    %27 = vector.load %arg0[%c1_15, %c32_16] : memref<10x290xf32, #tpu.memory_space<vmem>>, vector<8x256xf32>
    %cst_17 = arith.constant 0.0279328488 : f32
    %28 = vector.broadcast %cst_17 : f32 to vector<8x256xf32>
    %29 = arith.mulf %28, %27 : vector<8x256xf32>
    %30 = arith.addf %26, %29 : vector<8x256xf32>
    %c2_18 = arith.constant 2 : index
    %c32_19 = arith.constant 32 : index
    %31 = vector.load %arg0[%c2_18, %c32_19] : memref<10x290xf32, #tpu.memory_space<vmem>>, vector<8x256xf32>
    %cst_20 = arith.constant 0.011483537 : f32
    %32 = vector.broadcast %cst_20 : f32 to vector<8x256xf32>
    %33 = arith.mulf %32, %31 : vector<8x256xf32>
    %34 = arith.addf %30, %33 : vector<8x256xf32>
    %c0_21 = arith.constant 0 : index
    %c0_22 = arith.constant 0 : index
    %c0_23 = arith.constant 0 : index
    %35 = vector.load %arg1[%c0_21, %c0_22, %c0_23] : memref<3x8x256xf32, #tpu.memory_space<vmem>>, vector<1x8x256xf32>
    %36 = vector.shape_cast %35 : vector<1x8x256xf32> to vector<8x256xf32>
    %37 = arith.mulf %34, %36 : vector<8x256xf32>
    %c0_24 = arith.constant 0 : index
    %c1_25 = arith.constant 1 : index
    %38 = vector.load %arg0[%c0_24, %c1_25] : memref<10x290xf32, #tpu.memory_space<vmem>>, vector<8x256xf32>
    %cst_26 = arith.constant 0.0279328488 : f32
    %39 = vector.broadcast %cst_26 : f32 to vector<8x256xf32>
    %40 = arith.mulf %39, %38 : vector<8x256xf32>
    %c1_27 = arith.constant 1 : index
    %c1_28 = arith.constant 1 : index
    %41 = vector.load %arg0[%c1_27, %c1_28] : memref<10x290xf32, #tpu.memory_space<vmem>>, vector<8x256xf32>
    %cst_29 = arith.constant 0.0679445714 : f32
    %42 = vector.broadcast %cst_29 : f32 to vector<8x256xf32>
    %43 = arith.mulf %42, %41 : vector<8x256xf32>
    %44 = arith.addf %40, %43 : vector<8x256xf32>
    %c2_30 = arith.constant 2 : index
    %c1_31 = arith.constant 1 : index
    %45 = vector.load %arg0[%c2_30, %c1_31] : memref<10x290xf32, #tpu.memory_space<vmem>>, vector<8x256xf32>
    %cst_32 = arith.constant 0.0279328488 : f32
    %46 = vector.broadcast %cst_32 : f32 to vector<8x256xf32>
    %47 = arith.mulf %46, %45 : vector<8x256xf32>
    %48 = arith.addf %44, %47 : vector<8x256xf32>
    %c0_33 = arith.constant 0 : index
    %c17 = arith.constant 17 : index
    %49 = vector.load %arg0[%c0_33, %c17] : memref<10x290xf32, #tpu.memory_space<vmem>>, vector<8x256xf32>
    %cst_34 = arith.constant 0.0679445714 : f32
    %50 = vector.broadcast %cst_34 : f32 to vector<8x256xf32>
    %51 = arith.mulf %50, %49 : vector<8x256xf32>
    %52 = arith.addf %48, %51 : vector<8x256xf32>
    %c1_35 = arith.constant 1 : index
    %c17_36 = arith.constant 17 : index
    %53 = vector.load %arg0[%c1_35, %c17_36] : memref<10x290xf32, #tpu.memory_space<vmem>>, vector<8x256xf32>
    %cst_37 = arith.constant 0.165270105 : f32
    %54 = vector.broadcast %cst_37 : f32 to vector<8x256xf32>
    %55 = arith.mulf %54, %53 : vector<8x256xf32>
    %56 = arith.addf %52, %55 : vector<8x256xf32>
    %c2_38 = arith.constant 2 : index
    %c17_39 = arith.constant 17 : index
    %57 = vector.load %arg0[%c2_38, %c17_39] : memref<10x290xf32, #tpu.memory_space<vmem>>, vector<8x256xf32>
    %cst_40 = arith.constant 0.0679445714 : f32
    %58 = vector.broadcast %cst_40 : f32 to vector<8x256xf32>
    %59 = arith.mulf %58, %57 : vector<8x256xf32>
    %60 = arith.addf %56, %59 : vector<8x256xf32>
    %c0_41 = arith.constant 0 : index
    %c33 = arith.constant 33 : index
    %61 = vector.load %arg0[%c0_41, %c33] : memref<10x290xf32, #tpu.memory_space<vmem>>, vector<8x256xf32>
    %cst_42 = arith.constant 0.0279328488 : f32
    %62 = vector.broadcast %cst_42 : f32 to vector<8x256xf32>
    %63 = arith.mulf %62, %61 : vector<8x256xf32>
    %64 = arith.addf %60, %63 : vector<8x256xf32>
    %c1_43 = arith.constant 1 : index
    %c33_44 = arith.constant 33 : index
    %65 = vector.load %arg0[%c1_43, %c33_44] : memref<10x290xf32, #tpu.memory_space<vmem>>, vector<8x256xf32>
    %cst_45 = arith.constant 0.0679445714 : f32
    %66 = vector.broadcast %cst_45 : f32 to vector<8x256xf32>
    %67 = arith.mulf %66, %65 : vector<8x256xf32>
    %68 = arith.addf %64, %67 : vector<8x256xf32>
    %c2_46 = arith.constant 2 : index
    %c33_47 = arith.constant 33 : index
    %69 = vector.load %arg0[%c2_46, %c33_47] : memref<10x290xf32, #tpu.memory_space<vmem>>, vector<8x256xf32>
    %cst_48 = arith.constant 0.0279328488 : f32
    %70 = vector.broadcast %cst_48 : f32 to vector<8x256xf32>
    %71 = arith.mulf %70, %69 : vector<8x256xf32>
    %72 = arith.addf %68, %71 : vector<8x256xf32>
    %73 = arith.addf %37, %72 : vector<8x256xf32>
    %c0_49 = arith.constant 0 : index
    %c2_50 = arith.constant 2 : index
    %74 = vector.load %arg0[%c0_49, %c2_50] : memref<10x290xf32, #tpu.memory_space<vmem>>, vector<8x256xf32>
    %cst_51 = arith.constant 0.011483537 : f32
    %75 = vector.broadcast %cst_51 : f32 to vector<8x256xf32>
    %76 = arith.mulf %75, %74 : vector<8x256xf32>
    %c1_52 = arith.constant 1 : index
    %c2_53 = arith.constant 2 : index
    %77 = vector.load %arg0[%c1_52, %c2_53] : memref<10x290xf32, #tpu.memory_space<vmem>>, vector<8x256xf32>
    %cst_54 = arith.constant 0.0279328488 : f32
    %78 = vector.broadcast %cst_54 : f32 to vector<8x256xf32>
    %79 = arith.mulf %78, %77 : vector<8x256xf32>
    %80 = arith.addf %76, %79 : vector<8x256xf32>
    %c2_55 = arith.constant 2 : index
    %c2_56 = arith.constant 2 : index
    %81 = vector.load %arg0[%c2_55, %c2_56] : memref<10x290xf32, #tpu.memory_space<vmem>>, vector<8x256xf32>
    %cst_57 = arith.constant 0.011483537 : f32
    %82 = vector.broadcast %cst_57 : f32 to vector<8x256xf32>
    %83 = arith.mulf %82, %81 : vector<8x256xf32>
    %84 = arith.addf %80, %83 : vector<8x256xf32>
    %c0_58 = arith.constant 0 : index
    %c18 = arith.constant 18 : index
    %85 = vector.load %arg0[%c0_58, %c18] : memref<10x290xf32, #tpu.memory_space<vmem>>, vector<8x256xf32>
    %cst_59 = arith.constant 0.0279328488 : f32
    %86 = vector.broadcast %cst_59 : f32 to vector<8x256xf32>
    %87 = arith.mulf %86, %85 : vector<8x256xf32>
    %88 = arith.addf %84, %87 : vector<8x256xf32>
    %c1_60 = arith.constant 1 : index
    %c18_61 = arith.constant 18 : index
    %89 = vector.load %arg0[%c1_60, %c18_61] : memref<10x290xf32, #tpu.memory_space<vmem>>, vector<8x256xf32>
    %cst_62 = arith.constant 0.0679445714 : f32
    %90 = vector.broadcast %cst_62 : f32 to vector<8x256xf32>
    %91 = arith.mulf %90, %89 : vector<8x256xf32>
    %92 = arith.addf %88, %91 : vector<8x256xf32>
    %c2_63 = arith.constant 2 : index
    %c18_64 = arith.constant 18 : index
    %93 = vector.load %arg0[%c2_63, %c18_64] : memref<10x290xf32, #tpu.memory_space<vmem>>, vector<8x256xf32>
    %cst_65 = arith.constant 0.0279328488 : f32
    %94 = vector.broadcast %cst_65 : f32 to vector<8x256xf32>
    %95 = arith.mulf %94, %93 : vector<8x256xf32>
    %96 = arith.addf %92, %95 : vector<8x256xf32>
    %c0_66 = arith.constant 0 : index
    %c34 = arith.constant 34 : index
    %97 = vector.load %arg0[%c0_66, %c34] : memref<10x290xf32, #tpu.memory_space<vmem>>, vector<8x256xf32>
    %cst_67 = arith.constant 0.011483537 : f32
    %98 = vector.broadcast %cst_67 : f32 to vector<8x256xf32>
    %99 = arith.mulf %98, %97 : vector<8x256xf32>
    %100 = arith.addf %96, %99 : vector<8x256xf32>
    %c1_68 = arith.constant 1 : index
    %c34_69 = arith.constant 34 : index
    %101 = vector.load %arg0[%c1_68, %c34_69] : memref<10x290xf32, #tpu.memory_space<vmem>>, vector<8x256xf32>
    %cst_70 = arith.constant 0.0279328488 : f32
    %102 = vector.broadcast %cst_70 : f32 to vector<8x256xf32>
    %103 = arith.mulf %102, %101 : vector<8x256xf32>
    %104 = arith.addf %100, %103 : vector<8x256xf32>
    %c2_71 = arith.constant 2 : index
    %c34_72 = arith.constant 34 : index
    %105 = vector.load %arg0[%c2_71, %c34_72] : memref<10x290xf32, #tpu.memory_space<vmem>>, vector<8x256xf32>
    %cst_73 = arith.constant 0.011483537 : f32
    %106 = vector.broadcast %cst_73 : f32 to vector<8x256xf32>
    %107 = arith.mulf %106, %105 : vector<8x256xf32>
    %108 = arith.addf %104, %107 : vector<8x256xf32>
    %c2_74 = arith.constant 2 : index
    %c0_75 = arith.constant 0 : index
    %c0_76 = arith.constant 0 : index
    %109 = vector.load %arg1[%c2_74, %c0_75, %c0_76] : memref<3x8x256xf32, #tpu.memory_space<vmem>>, vector<1x8x256xf32>
    %110 = vector.shape_cast %109 : vector<1x8x256xf32> to vector<8x256xf32>
    %111 = arith.mulf %108, %110 : vector<8x256xf32>
    %112 = arith.addf %73, %111 : vector<8x256xf32>
    %c1_77 = arith.constant 1 : index
    %c17_78 = arith.constant 17 : index
    %113 = vector.load %arg0[%c1_77, %c17_78] : memref<10x290xf32, #tpu.memory_space<vmem>>, vector<8x256xf32>
    %cst_79 = arith.constant 5.000000e-02 : f32
    %114 = vector.broadcast %cst_79 : f32 to vector<8x256xf32>
    %115 = arith.addf %112, %114 : vector<8x256xf32>
    %116 = arith.minimumf %113, %115 : vector<8x256xf32>
    %cst_80 = arith.constant 5.000000e-02 : f32
    %117 = vector.broadcast %cst_80 : f32 to vector<8x256xf32>
    %118 = arith.subf %112, %117 : vector<8x256xf32>
    %119 = arith.maximumf %116, %118 : vector<8x256xf32>
    %c0_81 = arith.constant 0 : index
    %c0_82 = arith.constant 0 : index
    %120 = vector.load %arg2[%c0_81, %c0_82] : memref<8x256xf32, #tpu.memory_space<vmem>>, vector<8x256xf32>
    tpu.vector_store %arg2[%c0_81, %c0_82], %119 {strides = array<i32>} : memref<8x256xf32, #tpu.memory_space<vmem>>, vector<8x256xf32>,
    return
  }
}

</mosaic_0001>

<bundles_post_ra>
// kernel: forward.1
= control target key start
LH: loop header
LB: loop body
LE: loop exit
PB: predicated region body
PF: predicated region fallthrough
CT: control target
= control target key end

     0   :  { %s503_s15 = smov 112   ;;  %vm27_vm0 = vcmask 1046528   ;;  %vm50_vm1 = vcmask 1045504   ;;  %s505_s16 = smov 2   ;;  %vm74_vm2 = vcmask 916480   ;;  %vm161_vm3 = vcmask 785408   ;;  %s786_s0 = inlined_call_operand.vmem [shape: f32[10,290], index: 0, kind: input, shape index: {}]   ;;  %s787_s1 = inlined_call_operand.vmem [shape: f32[3,8,256], index: 1, kind: input, shape index: {}]   ;;  %s788_s2 = inlined_call_operand.vmem [shape: f32[8,256], index: 2, kind: output, shape index: {}]  }
   0x1   :  { %v528_v0 = vld [vmem:[%s786_s0 + $0x10] sm:$0xff]  ;;  %v533_v1 = vld [vmem:[%s786_s0 + $0x8] sm:$0xff]  ;;  %v538_v2 = vld [vmem:[%s786_s0] sm:$0xff]  ;;  %s506_s17 = smov 127   ;;  %vm395_vm4 = vcmask 15360   ;;  %s507_s18 = smov 126  }
   0x2   :  { %v541_v3 = vmul.f32 0.027932849, %v528_v0  ;;  %v223_v4 = vmul.f32 0.06794457, %v533_v1  ;;  %v545_v5 = vmul.f32 0.027932849, %v538_v2 }
   0x3   :  { %v224_v6 = vmul.f32 0.06794457, %v528_v0  ;;  %v222_v7 = vmul.f32 0.06794457, %v538_v2  ;;  %v557_v8 = vld [vmem:[%s786_s0 + $0x10] sm:$0xfe] }
   0x4   :  { %72 = vrot.lane.b32.xlu1 %v541_v3, %s503_s15  ;;  %230 = vrot.lane.b32.xlu2 %v223_v4, %s503_s15  ;;  %v562_v9 = vld [vmem:[%s786_s0 + $0x28] sm:$0x1]  ;;  %v567_v10 = vld [vmem:[%s786_s0 + $0x8] sm:$0xfe]  ;;  %v581_v14 = vmul.f32 0.027932849, %v533_v1 }
   0x5   :  { %68 = vrot.lane.b32.xlu0 %v545_v5, %s503_s15  ;;  %v572_v11 = vld [vmem:[%s786_s0 + $0x20] sm:$0x1]  ;;  %v84_v12 = vmul.f32 0.06794457, %v567_v10  ;;  %v578_v13 = vld [vmem:[%s786_s0] sm:$0xfe] }
   0x6   :  { %v87_v15 = vmul.f32 0.06794457, %v572_v11  ;;  %v587_v16 = vld [vmem:[%s786_s0 + $0x18] sm:$0x1]  ;;  %v83_v18 = vmul.f32 0.06794457, %v578_v13 }
   0x7   :  { %v98_v17 = vrot.slane %v84_v12, 1  ;;  %v86_v19 = vmul.f32 0.06794457, %v587_v16  ;;  %v85_v20 = vmul.f32 0.06794457, %v557_v8  ;;  %vm363_vm5 = vcmask 1039360  }
   0x8   :  { %v88_v21 = vmul.f32 0.06794457, %v562_v9  ;;  %v99_v22 = vrot.slane %v87_v15, 1  ;;  %v95_v23 = vrot.slane %v83_v18, 1  ;;  %v244_v31 = vmul.f32 0.1652701, %v557_v8 }
   0x9   :  { %v96_v24 = vrot.slane %v86_v19, 1  ;;  %v101_v28 = vrot.slane %v85_v20, 1  ;;  %v247_v32 = vmul.f32 0.1652701, %v562_v9  ;;  %v243_v33 = vmul.f32 0.1652701, %v567_v10 }
   0xa   :  { %v594_v25 = vsel %vm27_vm0, %v98_v17, %v99_v22  ;;  %v102_v29 = vrot.slane %v88_v21, 1  ;;  %v246_v34 = vmul.f32 0.1652701, %v572_v11  ;;  %v621_v36 = vld [vmem:[%s786_s0 + $0x10] sm:$0xfc]  ;;  %v260_v40 = vrot.slane %v244_v31, 1 }
   0xb   :  { %v600_v26 = vadd.f32 %v594_v25, %v581_v14  ;;  %v603_v27 = vsel %vm27_vm0, %v95_v23, %v96_v24  ;;  %v242_v37 = vmul.f32 0.1652701, %v578_v13  ;;  %v245_v38 = vmul.f32 0.1652701, %v587_v16  ;;  %v628_v39 = vld [vmem:[%s786_s0 + $0x28] sm:$0x3] }
   0xc   :  { %232 = vrot.lane.b32.xlu2 %v224_v6, %s503_s15  ;;  %228 = vrot.lane.b32.xlu1 %v222_v7, %s503_s15  ;;  %v609_v30 = vadd.f32 %v603_v27, %v545_v5  ;;  %v616_v35 = vsel %vm27_vm0, %v101_v28, %v102_v29  ;;  %v261_v41 = vrot.slane %v247_v32, 1  ;;  %v257_v42 = vrot.slane %v243_v33, 1  ;;  %v637_v44 = vld [vmem:[%s786_s0 + $0x8] sm:$0xfc]  ;;  %v646_v47 = vld [vmem:[%s786_s0 + $0x20] sm:$0x3] }
   0xd   :  { %70 = vrot.lane.b32.xlu0 %v581_v14, %s503_s15  ;;  %v258_v43 = vrot.slane %v246_v34, 1  ;;  %v120_v45 = vmul.f32 0.027932849, %v621_v36  ;;  %v123_v46 = vmul.f32 0.027932849, %v628_v39  ;;  %v254_v48 = vrot.slane %v242_v37, 1 }
   0xe   :  { %v255_v49 = vrot.slane %v245_v38, 1  ;;  %v651_v50 = vld [vmem:[%s786_s0] sm:$0xfc]  ;;  %v656_v51 = vld [vmem:[%s786_s0 + $0x18] sm:$0x3]  ;;  %v262_v54 = vsel %vm27_vm0, %v260_v40, %v261_v41  ;;  %s504_s0 = smov 96  }
   0xf   :  { %v119_v52 = vmul.f32 0.027932849, %v637_v44  ;;  %v122_v53 = vmul.f32 0.027932849, %v646_v47  ;;  %v259_v55 = vsel %vm27_vm0, %v257_v42, %v258_v43  ;;  %v118_v56 = vmul.f32 0.027932849, %v651_v50 }
  0x10   :  { %v121_v57 = vmul.f32 0.027932849, %v656_v51  ;;  %v256_v58 = vsel %vm27_vm0, %v254_v48, %v255_v49  ;;  %v136_v59 = vrot.slane %v120_v45, 2  ;;  %v137_v60 = vrot.slane %v123_v46, 2  ;;  %s509_s23 = smov 111  }
  0x11   :  { %v133_v61 = vrot.slane %v119_v52, 2  ;;  %v134_v62 = vrot.slane %v122_v53, 2  ;;  %v279_v63 = vmul.f32 0.06794457, %v621_v36  ;;  %v130_v4 = vrot.slane %v118_v56, 2 }
  0x12   :  { %v131_v6 = vrot.slane %v121_v57, 2  ;;  %v168_v7 = vmul.f32 0.027932849, %v557_v8  ;;  %v169_v12 = vmul.f32 0.027932849, %v562_v9  ;;  %v672_v15 = vsel %vm50_vm1, %v136_v59, %v137_v60 }
  0x13   :  { %v282_v17 = vmul.f32 0.06794457, %v628_v39  ;;  %v278_v18 = vmul.f32 0.06794457, %v637_v44  ;;  %v281_v19 = vmul.f32 0.06794457, %v646_v47  ;;  %v680_v24 = vsel %vm50_vm1, %v133_v61, %v134_v62 }
  0x14   :  { %108 = vrot.lane.b32.xlu2 %v616_v35, %s503_s15  ;;  %106 = vrot.lane.b32.xlu1 %v594_v25, %s503_s15  ;;  %v277_v20 = vmul.f32 0.06794457, %v651_v50  ;;  %v151_v21 = vmul.f32 0.011483537, %v528_v0  ;;  %v172_v22 = vrot.slane %v168_v7, 1  ;;  %v173_v23 = vrot.slane %v169_v12, 1 }
  0x15   :  { %104 = vrot.lane.b32.xlu0 %v603_v27, %s503_s15  ;;  %v20_v28 = vmul.f32 0.027932849, %v567_v10  ;;  %v22_v29 = vmul.f32 0.027932849, %v572_v11  ;;  %v19_v31 = vmul.f32 0.027932849, %v578_v13  ;;  %v686_v32 = vsel %vm50_vm1, %v130_v4, %v131_v6 }
  0x16   :  { %v280_v33 = vmul.f32 0.06794457, %v656_v51  ;;  %v174_v34 = vsel %vm27_vm0, %v172_v22, %v173_v23  ;;  %v21_v0 = vmul.f32 0.027932849, %v587_v16  ;;  %v14_v42 = vmul.f32 0.011483537, %v533_v1 }
  0x17   :  { %v371_v37 = vadd.f32 %v174_v34, %v151_v21  ;;  %v31_v38 = vrot.slane %v20_v28, 1  ;;  %v32_v40 = vrot.slane %v22_v29, 1  ;;  %v28_v41 = vrot.slane %v19_v31, 1 }
  0x18   :  { %v29_v43 = vrot.slane %v21_v0, 1  ;;  %v295_v45 = vrot.slane %v279_v63, 2  ;;  %v296_v46 = vrot.slane %v282_v17, 2  ;;  %v13_v48 = vmul.f32 0.011483537, %v538_v2 }
  0x19   :  { %v33_v49 = vsel %vm27_vm0, %v31_v38, %v32_v40  ;;  %v292_v52 = vrot.slane %v278_v18, 2  ;;  %v293_v53 = vrot.slane %v281_v19, 2  ;;  %v290_v56 = vrot.slane %v280_v33, 2 }
  0x1a   :  { %v30_v1 = vsel %vm27_vm0, %v28_v41, %v29_v43  ;;  %v187_v2 = vmul.f32 0.011483537, %v621_v36  ;;  %v188_v61 = vmul.f32 0.011483537, %v628_v39  ;;  %v43_v4 = vmul.f32 0.011483537, %v637_v44 }
  0x1b   :  { %v36_v57 = vadd.f32 %v30_v1, %v13_v48  ;;  %v294_v59 = vsel %vm50_vm1, %v292_v52, %v293_v53  ;;  %v45_v6 = vmul.f32 0.011483537, %v646_v47  ;;  %v42_v7 = vmul.f32 0.011483537, %v651_v50 }
  0x1c   :  { %267 = vrot.lane.b32.xlu2 %v262_v54, %s503_s15  ;;  %265 = vrot.lane.b32.xlu1 %v259_v55, %s503_s15  ;;  %v37_v54 = vadd.f32 %v33_v49, %v14_v42  ;;  %v289_v55 = vrot.slane %v277_v20, 2  ;;  %v191_v62 = vrot.slane %v187_v2, 2  ;;  %v192_v63 = vrot.slane %v188_v61, 2 }
  0x1d   :  { %263 = vrot.lane.b32.xlu0 %v256_v58, %s503_s15  ;;  %v297_v58 = vsel %vm50_vm1, %v295_v45, %v296_v46  ;;  %v44_v17 = vmul.f32 0.011483537, %v656_v51  ;;  %v54_v19 = vrot.slane %v43_v4, 2  ;;  %v55_v20 = vrot.slane %v45_v6, 2 }
  0x1e   :  { %v291_v60 = vsel %vm50_vm1, %v289_v55, %v290_v56  ;;  %v193_v12 = vsel %vm50_vm1, %v191_v62, %v192_v63  ;;  %v51_v22 = vrot.slane %v42_v7, 2  ;;  %v215_v50 = vadd.f32 %v616_v35, %v541_v3 }
  0x1f   :  { %v373_v18 = vadd.f32 %v371_v37, %v193_v12  ;;  %v52_v23 = vrot.slane %v44_v17, 2  ;;  %v56_v36 = vsel %vm50_vm1, %v54_v19, %v55_v20  ;;  %v219_v37 = vadd.f32 %v609_v30, %v686_v32 }
  0x20   :  { %v60_v39 = vadd.f32 %v56_v36, %v37_v54  ;;  %v221_v51 = vadd.f32 %v215_v50, %v672_v15  ;;  %vm412_vm6 = vcmask 1031168   ;;  %vm429_vm7 = vcmask 138240  }
  0x21   :  { %v53_v44 = vsel %vm50_vm1, %v51_v22, %v52_v23  ;;  %vm481_vm8 = vcmask 908288  }
  0x22   :  { %v59_v47 = vadd.f32 %v53_v44, %v36_v57 }
  0x24   :  { %143 = vrot.lane.b32.xlu2 %v672_v15, %s503_s15  ;;  %141 = vrot.lane.b32.xlu1 %v680_v24, %s503_s15 }
  0x25   :  { %139 = vrot.lane.b32.xlu0 %v686_v32, %s503_s15 }
  0x2c   :  { %302 = vrot.lane.b32.xlu2 %v297_v58, %s503_s15  ;;  %300 = vrot.lane.b32.xlu1 %v294_v59, %s503_s15 }
  0x2d   :  { %298 = vrot.lane.b32.xlu0 %v291_v60, %s503_s15 }
  0x34   :  { %159 = vrot.lane.b32.xlu2 %v151_v21, %s504_s0  ;;  %157 = vrot.lane.b32.xlu1 %v14_v42, %s504_s0 }
  0x35   :  { %155 = vrot.lane.b32.xlu0 %v13_v48, %s504_s0 }
  0x3c   :  { %316 = vrot.lane.b32.xlu2 %v541_v3, %s504_s0  ;;  %314 = vrot.lane.b32.xlu1 %v581_v14, %s504_s0  ;;  %v492_v14 = vld [vmem:[%s787_s1 + $0x20] sm:$0xff] }
  0x3d   :  { %312 = vrot.lane.b32.xlu0 %v545_v5, %s504_s0  ;;  %v493_v5 = vld [vmem:[%s787_s1 + $0x28] sm:$0xff] }
  0x44   :  { %179 = vrot.lane.b32.xlu2 %v174_v34, %s504_s0  ;;  %177 = vrot.lane.b32.xlu1 %v33_v49, %s504_s0 }
  0x45   :  { %175 = vrot.lane.b32.xlu0 %v30_v1, %s504_s0 }
  0x4c   :  { %330 = vrot.lane.b32.xlu2 %v616_v35, %s504_s0  ;;  %328 = vrot.lane.b32.xlu1 %v594_v25, %s504_s0  ;;  %v220_v25 = vadd.f32 %v600_v26, %v680_v24 }
  0x4d   :  { %326 = vrot.lane.b32.xlu0 %v603_v27, %s504_s0 }
  0x54   :  { %198 = vrot.lane.b32.xlu2 %v193_v12, %s504_s0  ;;  %196 = vrot.lane.b32.xlu1 %v56_v36, %s504_s0 }
  0x55   :  { %194 = vrot.lane.b32.xlu0 %v53_v44, %s504_s0 }
  0x5c   :  { %344 = vrot.lane.b32.xlu2 %v672_v15, %s504_s0  ;;  %342 = vrot.lane.b32.xlu1 %v680_v24, %s504_s0 }
  0x5d   :  { %340 = vrot.lane.b32.xlu0 %v686_v32, %s504_s0 }
  0x5e   :  { %v231_v3 = vpop.permute.xlu2 %230 }
  0x64   :  { %393 = vrot.lane.b32.xlu1 %v493_v5, %s505_s16 }
  0x65   :  { %391 = vrot.lane.b32.xlu0 %v492_v14, %s505_s16 }
  0x66   :  { %v233_v27 = vpop.permute.xlu2 %232 }
  0x67   :  { %v235_v35 = vsel %vm74_vm2, %v231_v3, %v233_v27  ;;  %v241_v15 = vadd.f32 %v233_v27, %v221_v51 }
  0x68   :  { %v240_v21 = vadd.f32 %v235_v35, %v220_v25 }
  0x6e   :  { %v109_v28 = vpop.permute.xlu2 %108 }
  0x76   :  { %v73_v29 = vpop.permute.xlu1 %72  ;;  %v268_v31 = vpop.permute.xlu2 %267 }
  0x77   :  { %v375_v33 = vadd.f32 %v373_v18, %v73_v29  ;;  %v69_v34 = vpop.permute.xlu0 %68 }
  0x79   :  { %v377_v0 = vadd.f32 %v375_v33, %v109_v28 }
  0x7e   :  { %v144_v38 = vpop.permute.xlu2 %143  ;;  %v229_v26 = vpop.permute.xlu1 %228 }
  0x7f   :  { %v379_v24 = vadd.f32 %v377_v0, %v144_v38  ;;  %v234_v40 = vsel %vm74_vm2, %v229_v26, %v231_v3  ;;  %v71_v41 = vpop.permute.xlu0 %70 }
  0x80   :  { %v239_v42 = vadd.f32 %v234_v40, %v219_v37  ;;  %v75_v43 = vsel %vm74_vm2, %v69_v34, %v71_v41  ;;  %v76_v45 = vsel %vm74_vm2, %v71_v41, %v73_v29 }
  0x81   :  { %v79_v46 = vadd.f32 %v75_v43, %v59_v47  ;;  %v80_v48 = vadd.f32 %v76_v45, %v60_v39  ;;  %v276_v47 = vadd.f32 %v268_v31, %v241_v15 }
  0x86   :  { %v303_v49 = vpop.permute.xlu2 %302  ;;  %v107_v52 = vpop.permute.xlu1 %106 }
  0x87   :  { %v111_v53 = vsel %vm74_vm2, %v107_v52, %v109_v28  ;;  %v105_v54 = vpop.permute.xlu0 %104  ;;  %v311_v51 = vadd.f32 %v303_v49, %v276_v47 }
  0x88   :  { %v115_v1 = vadd.f32 %v111_v53, %v80_v48  ;;  %v110_v30 = vsel %vm74_vm2, %v105_v54, %v107_v52 }
  0x89   :  { %v114_v32 = vadd.f32 %v110_v30, %v79_v46 }
  0x8e   :  { %v160_v55 = vpop.permute.xlu2 %159  ;;  %v266_v56 = vpop.permute.xlu1 %265 }
  0x8f   :  { %v381_v57 = vadd.f32 %v379_v24, %v160_v55  ;;  %v270_v58 = vsel %vm74_vm2, %v266_v56, %v268_v31  ;;  %v264_v59 = vpop.permute.xlu0 %263 }
  0x90   :  { %v275_v60 = vadd.f32 %v270_v58, %v240_v21  ;;  %v269_v29 = vsel %vm74_vm2, %v264_v59, %v266_v56 }
  0x91   :  { %v274_v15 = vadd.f32 %v269_v29, %v239_v42 }
  0x96   :  { %v317_v2 = vpop.permute.xlu2 %316  ;;  %v142_v61 = vpop.permute.xlu1 %141 }
  0x97   :  { %v146_v62 = vsel %vm74_vm2, %v142_v61, %v144_v38  ;;  %v140_v63 = vpop.permute.xlu0 %139  ;;  %v325_v3 = vadd.f32 %v317_v2, %v311_v51 }
  0x98   :  { %v150_v4 = vadd.f32 %v146_v62, %v115_v1  ;;  %v145_v41 = vsel %vm74_vm2, %v140_v63, %v142_v61 }
  0x99   :  { %v149_v53 = vadd.f32 %v145_v41, %v114_v32 }
  0x9e   :  { %v180_v6 = vpop.permute.xlu2 %179  ;;  %v301_v7 = vpop.permute.xlu1 %300 }
  0x9f   :  { %v305_v12 = vsel %vm74_vm2, %v301_v7, %v303_v49  ;;  %v299_v17 = vpop.permute.xlu0 %298  ;;  %v383_v59 = vadd.f32 %v381_v57, %v180_v6 }
  0xa0   :  { %v310_v18 = vadd.f32 %v305_v12, %v275_v60  ;;  %v304_v0 = vsel %vm74_vm2, %v299_v17, %v301_v7 }
  0xa1   :  { %v309_v38 = vadd.f32 %v304_v0, %v274_v15 }
  0xa6   :  { %v331_v19 = vpop.permute.xlu2 %330  ;;  %v158_v20 = vpop.permute.xlu1 %157 }
  0xa7   :  { %v163_v22 = vsel %vm161_vm3, %v158_v20, %v160_v55  ;;  %v156_v23 = vpop.permute.xlu0 %155  ;;  %v339_v5 = vadd.f32 %v331_v19, %v325_v3 }
  0xa8   :  { %v167_v36 = vadd.f32 %v163_v22, %v150_v4  ;;  %v162_v48 = vsel %vm161_vm3, %v156_v23, %v158_v20  ;;  %v206_v23 = vld [vmem:[%s787_s1] sm:$0xff] }
  0xa9   :  { %v166_v56 = vadd.f32 %v162_v48, %v149_v53 }
  0xae   :  { %v199_v39 = vpop.permute.xlu2 %198  ;;  %v315_v44 = vpop.permute.xlu1 %314 }
  0xaf   :  { %v313_v50 = vpop.permute.xlu0 %312  ;;  %v319_v31 = vsel %vm161_vm3, %v315_v44, %v317_v2  ;;  %v385_v32 = vadd.f32 %v383_v59, %v199_v39 }
  0xb0   :  { %v318_v37 = vsel %vm161_vm3, %v313_v50, %v315_v44  ;;  %v324_v24 = vadd.f32 %v319_v31, %v310_v18 }
  0xb1   :  { %v323_v43 = vadd.f32 %v318_v37, %v309_v38 }
  0xb6   :  { %v345_v14 = vpop.permute.xlu2 %344  ;;  %v178_v25 = vpop.permute.xlu1 %177 }
  0xb7   :  { %v353_v27 = vadd.f32 %v345_v14, %v339_v5  ;;  %v176_v35 = vpop.permute.xlu0 %175  ;;  %v182_v58 = vsel %vm161_vm3, %v178_v25, %v180_v6 }
  0xb8   :  { %v181_v30 = vsel %vm161_vm3, %v176_v35, %v178_v25  ;;  %v186_v62 = vadd.f32 %v182_v58, %v167_v36  ;;  %v207_v36 = vld [vmem:[%s787_s1 + $0x8] sm:$0xff]  ;;  %s508_s1 = smov 17  }
  0xb9   :  { %361 = vrot.lane.b32.xlu1 %v353_v27, %s506_s17  ;;  %v185_v2 = vadd.f32 %v181_v30, %v166_v56 }
  0xbe   :  { %v329_v21 = vpop.permute.xlu1 %328 }
  0xbf   :  { %v327_v28 = vpop.permute.xlu0 %326  ;;  %v333_v26 = vsel %vm161_vm3, %v329_v21, %v331_v19 }
  0xc0   :  { %v332_v40 = vsel %vm161_vm3, %v327_v28, %v329_v21  ;;  %v338_v45 = vadd.f32 %v333_v26, %v324_v24 }
  0xc1   :  { %v337_v49 = vadd.f32 %v332_v40, %v323_v43 }
  0xc6   :  { %v197_v33 = vpop.permute.xlu1 %196 }
  0xc7   :  { %v195_v34 = vpop.permute.xlu0 %194  ;;  %v201_v61 = vsel %vm161_vm3, %v197_v33, %v199_v39 }
  0xc8   :  { %v200_v60 = vsel %vm161_vm3, %v195_v34, %v197_v33  ;;  %v205_v7 = vadd.f32 %v201_v61, %v186_v62 }
  0xc9   :  { %v204_v63 = vadd.f32 %v200_v60, %v185_v2 }
  0xca   :  { %v209_v47 = vmul.f32 %v207_v36, %v205_v7 }
  0xcb   :  { %v208_v50 = vmul.f32 %v206_v23, %v204_v63 }
  0xce   :  { %v343_v46 = vpop.permute.xlu1 %342 }
  0xcf   :  { %v347_v42 = vsel %vm161_vm3, %v343_v46, %v345_v14  ;;  %v341_v52 = vpop.permute.xlu0 %340 }
  0xd0   :  { %v352_v54 = vadd.f32 %v347_v42, %v338_v45  ;;  %v346_v1 = vsel %vm161_vm3, %v341_v52, %v343_v46 }
  0xd1   :  { %v351_v55 = vadd.f32 %v346_v1, %v337_v49 }
  0xd2   :  { %359 = vrot.lane.b32.xlu0 %v352_v54, %s506_s17 }
  0xd3   :  { %357 = vrot.lane.b32.xlu2 %v351_v55, %s506_s17 }
  0xd6   :  { %v394_v4 = vpop.permute.xlu1 %393 }
  0xd7   :  { %v402_v12 = vmul.f32 %v394_v4, %v385_v32  ;;  %v392_v17 = vpop.permute.xlu0 %391 }
  0xd8   :  { %v396_v18 = vsel %vm395_vm4, %v392_v17, %v394_v4  ;;  %v400_v19 = vmul.f32 %v392_v17, %v204_v63 }
  0xd9   :  { %v401_v20 = vmul.f32 %v396_v18, %v205_v7  ;;  %410 = vrot.lane.b32.xlu1 %v402_v12, %s507_s18 }
  0xdb   :  { %408 = vrot.lane.b32.xlu0 %v401_v20, %s507_s18  ;;  %406 = vrot.lane.b32.xlu2 %v400_v19, %s507_s18 }
 0x12b   :  { %v362_v57 = vpop.permute.xlu1 %361 }
 0x12d   :  { %v358_v6 = vpop.permute.xlu2 %357 }
 0x135   :  { %v407_v3 = vpop.permute.xlu2 %406 }
 0x144   :  { %v360_v22 = vpop.permute.xlu0 %359 }
 0x145   :  { %v364_v39 = vsel %vm363_vm5, %v358_v6, %v360_v22  ;;  %v365_v44 = vsel %vm363_vm5, %v360_v22, %v362_v57 }
 0x146   :  { %v368_v5 = vadd.f32 %v364_v39, %v208_v50  ;;  %v369_v14 = vadd.f32 %v365_v44, %v209_v47 }
 0x14b   :  { %v411_v51 = vpop.permute.xlu1 %410 }
 0x14d   :  { %v409_v25 = vpop.permute.xlu0 %408 }
 0x14e   :  { %v413_v27 = vsel %vm412_vm6, %v407_v3, %v409_v25  ;;  %v414_v35 = vsel %vm412_vm6, %v409_v25, %v411_v51 }
 0x14f   :  { %v417_v21 = vadd.f32 %v413_v27, %v368_v5  ;;  %v418_v28 = vadd.f32 %v414_v35, %v369_v14 }
 0x151   :  { %v420_v29 = vadd.f32 0.05, %v418_v28  ;;  %v494_v33 = vadd.f32 -0.05, %v417_v21  ;;  %v419_v34 = vadd.f32 0.05, %v417_v21 }
 0x152   :  { %v495_v37 = vadd.f32 -0.05, %v418_v28 }
 0x153   :  { %v424_v0 = vrot.slane %v420_v29, 7  ;;  %v444_v15 = vrot.slane %v494_v33, 7  ;;  %v423_v31 = vrot.slane %v419_v34, 7 }
 0x154   :  { %v445_v38 = vrot.slane %v495_v37, 7 }
 0x155   :  { %427 = vrot.lane.b32.xlu0 %v424_v0, %s508_s1  ;;  %446 = vrot.lane.b32.xlu1 %v444_v15, %s508_s1 }
 0x156   :  { %425 = vrot.lane.b32.xlu2 %v423_v31, %s508_s1 }
 0x15e   :  { %448 = vrot.lane.b32.xlu2 %v445_v38, %s508_s1 }
 0x1b0   :  { %v426_v26 = vpop.permute.xlu2 %425 }
 0x1b1   :  { %v434_v24 = vmin.f32 %v578_v13, %v426_v26  ;;  %v437_v40 = vmin.f32 %v587_v16, %v426_v26 }
 0x1b8   :  { %v449_v49 = vpop.permute.xlu2 %448 }
 0x1c7   :  { %v428_v41 = vpop.permute.xlu0 %427  ;;  %v447_v43 = vpop.permute.xlu1 %446 }
 0x1c8   :  { %v430_v45 = vsel %vm429_vm7, %v426_v26, %v428_v41  ;;  %v436_v46 = vmin.f32 %v557_v8, %v428_v41  ;;  %v439_v48 = vmin.f32 %v562_v9, %v428_v41  ;;  %v454_v53 = vmax.f32 %v434_v24, %v447_v43 }
 0x1c9   :  { %v435_v42 = vmin.f32 %v567_v10, %v430_v45  ;;  %v438_v52 = vmin.f32 %v572_v11, %v430_v45  ;;  %v457_v54 = vmax.f32 %v437_v40, %v447_v43  ;;  %v450_v55 = vsel %vm429_vm7, %v447_v43, %v449_v49 }
 0x1ca   :  { %v456_v1 = vmax.f32 %v436_v46, %v449_v49  ;;  %v459_v30 = vmax.f32 %v439_v48, %v449_v49  ;;  %v466_v16 = vrot.slane %v454_v53, 1 }
 0x1cb   :  { %v455_v13 = vmax.f32 %v435_v42, %v450_v55  ;;  %v458_v56 = vmax.f32 %v438_v52, %v450_v55  ;;  %v467_v58 = vrot.slane %v457_v54, 1 }
 0x1cc   :  { %v472_v59 = vrot.slane %v456_v1, 1  ;;  %v473_v60 = vrot.slane %v459_v30, 1 }
 0x1cd   :  { %v469_v2 = vrot.slane %v455_v13, 1  ;;  %v470_v8 = vrot.slane %v458_v56, 1  ;;  %v468_v9 = vsel %vm27_vm0, %v466_v16, %v467_v58 }
 0x1ce   :  { %475 = vrot.lane.b32.xlu0 %v468_v9, %s509_s23  ;;  %v474_v10 = vsel %vm27_vm0, %v472_v59, %v473_v60 }
 0x1cf   :  { %479 = vrot.lane.b32.xlu2 %v474_v10, %s509_s23  ;;  %v471_v11 = vsel %vm27_vm0, %v469_v2, %v470_v8 }
 0x1d0   :  { %477 = vrot.lane.b32.xlu1 %v471_v11, %s509_s23 }
 0x229   :  { %v480_v61 = vpop.permute.xlu2 %479 }
 0x240   :  { %v476_v32 = vpop.permute.xlu0 %475 }
 0x242   :  { %v478_v62 = vpop.permute.xlu1 %477 }
 0x243   :  { %v482_v63 = vsel %vm481_vm8, %v476_v32, %v478_v62  ;;  %v483_v4 = vsel %vm481_vm8, %v478_v62, %v480_v61 }
 0x244   :  { %486 = vst [vmem:[%s788_s2] sm:$0xff] %v482_v63 }
 0x245   :  { %487 = vst [vmem:[%s788_s2 + $0x8] sm:$0xff] %v483_v4 }

</bundles_post_ra>
